<compile_context>
chip_gen: v6e
topology: v6e:2x2x1
jax: 0.10.0
libtpu: 0.0.40
codegen_flags: <defaults>
</compile_context>

<pallas_src>
import functools

import jax
import jax.numpy as jnp
import numpy as np
from jax.experimental import pallas as pl
from jax.experimental.pallas import tpu as pltpu


_LANES = 128
_MAX_TILE_ROWS = 4096                       # 4096*128 px/step cap (compile time / diminishing returns)
_DEFAULT_VMEM_CAP = 64 * 1024 * 1024


def _cdiv(a, b):
    return -(-a // b)


def _round_up(x, m):
    return _cdiv(x, m) * m


def _vmem_budget():
    """Per-chip VMEM sizing (review item 5)."""
    cap = _DEFAULT_VMEM_CAP
    try:
        info = pltpu.get_tpu_info()
        cap = int(getattr(info, "vmem_capacity_bytes", cap))
    except Exception:
        pass
    work = cap // 4                                   # pipeline buffers + live temporaries
    limit = min((cap * 3) // 4, 64 * 1024 * 1024)     # ~48 MiB on v7x, 64 MiB on v5e/v6e
    return work, limit


def _choose_tiling(batch, num_classes, hw, score_isz, label_isz, ignore_isz,
                   apply_softmax, tile_rows):
    """Pick (n_split, k_steps, tile_r, rows_padded, vmem_limit)."""
    work, limit = _vmem_budget()
    rows = max(8, _round_up(_cdiv(hw, _LANES), 8))
    # v7x: if there is no batch parallelism, split rows across the 2 TensorCores.
    n_split = 2 if (batch == 1 and rows >= 16) else 1
    if tile_rows is not None:
        tr = max(8, _round_up(tile_rows, 8))
    else:
        in_bytes = _LANES * (num_classes * score_isz + label_isz + ignore_isz)
        tmp_bytes = _LANES * 4 * ((num_classes + 6) if apply_softmax else 8)
        per_row = 2 * in_bytes + tmp_bytes            # double-buffered inputs + live f32 slabs
        tr = max(8, min(_MAX_TILE_ROWS, (work // per_row) // 8 * 8))
    k_steps = _cdiv(rows, n_split * tr)
    tile_r = _round_up(_cdiv(rows, n_split * k_steps), 8)   # <= tr, multiple of 8
    rows_padded = n_split * k_steps * tile_r                # every tile is full
    return n_split, k_steps, tile_r, rows_padded, limit


def _dice_sums_kernel(score_ref, labels_ref, *rest, num_classes, apply_softmax,
                      has_ignore, mask_neg_labels):
    """Fused softmax / one-hot / masking / partial dice reductions for one tile.

    score_ref : (C, TR, 128) native float  — per-class lane-dense slabs
    labels_ref: (TR, 128)    native int    — class labels (-1 on padded pixels)
    ignore_ref: (TR, 128)    optional      — elements where ignore == 1 excluded
    out_ref   : (3, C) f32                 — [intersect; y_sum; z_sum], stored once
    acc_ref   : (3, C, 128) f32 scratch    — per-lane partial sums
    """
    if has_ignore:
        ignore_ref, out_ref, acc_ref = rest
    else:
        out_ref, acc_ref = rest

    C = num_classes
    k = pl.program_id(2)

    @pl.when(k == 0)
    def _():
        acc_ref[...] = jnp.zeros_like(acc_ref)

    labels = labels_ref[...]                                   # (TR, 128) int

    # Validity mask — only materialized when actually needed (no ignore, no
    # padding => zero masking cost on every tile).
    valid_f = None
    if has_ignore:
        valid = ignore_ref[...] != 1
        if mask_neg_labels:
            valid = jnp.logical_and(valid, labels >= 0)
        valid_f = valid.astype(jnp.float32)
    elif mask_neg_labels:
        valid_f = (labels >= 0).astype(jnp.float32)

    # Optional channel softmax: elementwise across the C lane-dense slabs
    # (VPU/EUP only, no cross-sublane/lane XLU reduce).
    if apply_softmax:
        s = [score_ref[c].astype(jnp.float32) for c in range(C)]
        m = s[0]
        for c in range(1, C):
            m = jnp.maximum(m, s[c])
        e = [jnp.exp(s[c] - m) for c in range(C)]
        denom = e[0]
        for c in range(1, C):
            denom = denom + e[c]
        inv = pl.reciprocal(denom, approx=False)   # exact: parity with torch.softmax
        probs = [e[c] * inv for c in range(C)]

    def fold(x):                                   # (TR, 128) -> (1, 128) per-lane partial
        return jnp.sum(x, axis=0, keepdims=True)

    for c in range(C):
        # Cast fused into first use per class slab (no extra full f32 tile copy
        # on the no-softmax path).
        p = probs[c] if apply_softmax else score_ref[c].astype(jnp.float32)
        onehot = labels == c                                    # (TR, 128) bool
        if valid_f is not None:
            pv = p * valid_f                                    # score * valid
            ohv = jnp.where(onehot, valid_f, 0.0)               # one-hot ∧ valid
        else:
            pv = p
            ohv = jnp.where(onehot, 1.0, 0.0)
        acc_ref[0, c:c + 1, :] += fold(jnp.where(onehot, pv, 0.0))   # intersect
        acc_ref[1, c:c + 1, :] += fold(ohv)                          # y_sum
        acc_ref[2, c:c + 1, :] += fold(pv * p)                       # z_sum

    # Cross-lane reduce + tiny (3, C) HBM store only once per (batch, split).
    @pl.when(k == pl.num_programs(2) - 1)
    def _():
        out_ref[...] = jnp.sum(acc_ref[...], axis=-1)


def _dice_class_sums(score, labels, ignore, *, apply_softmax, mask_neg_labels,
                     n_split, k_steps, tile_r, vmem_limit):
    """score: (B, C, R, 128); labels: (B, R, 128); ignore: (B, R, 128) or None.
    Returns (B, n_split, 3, C) f32 partial [intersect; y_sum; z_sum]."""
    B, C, _, _ = score.shape
    has_ignore = ignore is not None

    kernel = functools.partial(
        _dice_sums_kernel, num_classes=C, apply_softmax=apply_softmax,
        has_ignore=has_ignore, mask_neg_labels=mask_neg_labels)

    in_specs = [
        pl.BlockSpec((None, C, tile_r, _LANES),
                     lambda b, p, k: (b, 0, p * k_steps + k, 0)),
        pl.BlockSpec((None, tile_r, _LANES),
                     lambda b, p, k: (b, p * k_steps + k, 0)),
    ]
    operands = [score, labels]
    if has_ignore:
        in_specs.append(pl.BlockSpec((None, tile_r, _LANES),
                                     lambda b, p, k: (b, p * k_steps + k, 0)))
        operands.append(ignore)

    return pl.pallas_call(
        kernel,
        out_shape=jax.ShapeDtypeStruct((B, n_split, 3, C), jnp.float32),
        grid_spec=pltpu.PrefetchScalarGridSpec(
            num_scalar_prefetch=0,
            grid=(B, n_split, k_steps),
            in_specs=in_specs,
            out_specs=pl.BlockSpec((None, None, 3, C),
                                   lambda b, p, k: (b, p, 0, 0)),
            scratch_shapes=[pltpu.VMEM((3, C, _LANES), jnp.float32)],
        ),
        compiler_params=pltpu.CompilerParams(
            dimension_semantics=("parallel", "parallel", "arbitrary"),
            vmem_limit_bytes=vmem_limit,
        ),
    )(*operands)


def dice_loss(inputs, target, num_classes, weight=None, softmax=False,
              ignore=None, tile_rows=None):
    """JAX/Pallas equivalent of DiceLoss(num_classes, is_3d=False).forward.

    inputs : (B, C, H, W) float — raw scores (softmax over C if softmax=True)
    target : (B, H, W)    int   — class labels in [0, num_classes)
    ignore : (B, H, W) or None  — elements where ignore == 1 are excluded
    tile_rows : optional override of the spatial row tile (testing / tuning)
    Returns a scalar float32 loss.
    """
    B, C, H, W = inputs.shape
    assert C == num_classes, "predict & target shape do not match"
    if weight is not None:
        assert len(weight) == num_classes, "weight length must equal num_classes"
    HW = H * W

    ig_isz = ignore.dtype.itemsize if ignore is not None else 0
    n_split, k_steps, tile_r, rows_padded, vmem_limit = _choose_tiling(
        B, C, HW, inputs.dtype.itemsize, target.dtype.itemsize, ig_isz,
        softmax, tile_rows)
    hw_padded = rows_padded * _LANES

    score = inputs.reshape(B, C, HW)            # layout-preserving: no transpose, no upcast
    labels = target.reshape(B, HW)              # native dtype, no merge pass
    ig = ignore.reshape(B, HW) if ignore is not None else None

    padded = hw_padded != HW
    if padded:
        pad = hw_padded - HW
        score = jnp.pad(score, ((0, 0), (0, 0), (0, pad)))
        if not jnp.issubdtype(labels.dtype, jnp.signedinteger):
            labels = labels.astype(jnp.int32)
        labels = jnp.pad(labels, ((0, 0), (0, pad)), constant_values=-1)
        if ig is not None:
            ig = jnp.pad(ig, ((0, 0), (0, pad)), constant_values=1)

    score = score.reshape(B, C, rows_padded, _LANES)
    labels = labels.reshape(B, rows_padded, _LANES)
    if ig is not None:
        ig = ig.reshape(B, rows_padded, _LANES)

    # Padded pixels need an explicit in-kernel check only when there is no
    # ignore stream to carry it (padded ignore == 1 already excludes them).
    mask_neg_labels = padded and ignore is None

    sums = _dice_class_sums(score, labels, ig, apply_softmax=softmax,
                            mask_neg_labels=mask_neg_labels, n_split=n_split,
                            k_steps=k_steps, tile_r=tile_r,
                            vmem_limit=vmem_limit)           # (B, NS, 3, C)
    sums = jnp.sum(sums, axis=(0, 1))                        # (3, C)
    intersect, y_sum, z_sum = sums[0], sums[1], sums[2]

    smooth = 1e-5
    dice = 1.0 - (2.0 * intersect + smooth) / (z_sum + y_sum + smooth)

    if weight is None:
        w = jnp.ones((num_classes,), jnp.float32)
    else:
        w = jnp.asarray(weight, jnp.float32)
    return jnp.sum(dice * w) / num_classes


def _reference_dice_loss(inputs, target, num_classes, weight=None, softmax=False,
                         ignore=None):
    """Pure-JAX reference mirroring the PyTorch forward, for validation."""
    x = jnp.asarray(inputs, jnp.float32)
    if softmax:
        x = jax.nn.softmax(x, axis=1)
    onehot = jax.nn.one_hot(target, num_classes, dtype=jnp.float32)      # (B,H,W,C)
    onehot = jnp.transpose(onehot, (0, 3, 1, 2))                         # (B,C,H,W)
    if ignore is None:
        valid = jnp.ones(target.shape, jnp.float32)
    else:
        valid = (ignore != 1).astype(jnp.float32)
    if weight is None:
        weight = [1.0] * num_classes
    smooth = 1e-5
    loss = 0.0
    for i in range(num_classes):
        s = x[:, i] * valid
        t = onehot[:, i] * valid
        inter = jnp.sum(s * t)
        ysum = jnp.sum(t * t)
        zsum = jnp.sum(s * s)
        d = 1.0 - (2 * inter + smooth) / (zsum + ysum + smooth)
        loss = loss + d * weight[i]
    return loss / num_classes


if __name__ == "__main__":
    key = jax.random.PRNGKey(0)
    k1, k2, k3, k4, k5, k6 = jax.random.split(key, 6)

    # Cases 1 & 2: B=2, C=4, 16x16 — softmax+ignore, and raw scores + weights.
    B, C, H, W = 2, 4, 16, 16
    inputs = jax.random.normal(k1, (B, C, H, W), jnp.float32)
    target = jax.random.randint(k2, (B, H, W), 0, C, jnp.int32)
    ignore = (jax.random.uniform(k3, (B, H, W)) < 0.1).astype(jnp.float32)

    loss1 = jax.block_until_ready(
        dice_loss(inputs, target, C, softmax=True, ignore=ignore))
    ref1 = _reference_dice_loss(inputs, target, C, softmax=True, ignore=ignore)
    np.testing.assert_allclose(np.asarray(loss1), np.asarray(ref1),
                               rtol=1e-4, atol=1e-5)

    wts = [1.0, 2.0, 0.5, 1.5]
    loss2 = jax.block_until_ready(
        dice_loss(inputs, target, C, weight=wts, softmax=False, ignore=None))
    ref2 = _reference_dice_loss(inputs, target, C, weight=wts, softmax=False,
                                ignore=None)
    np.testing.assert_allclose(np.asarray(loss2), np.asarray(ref2),
                               rtol=1e-5, atol=1e-6)

    # Case 3: B=1, 64x64, small tile override — exercises multi-tile
    # accumulation and the 2-way row split (n_split=2, k_steps=2).
    B3, C3, H3, W3 = 1, 3, 64, 64
    inp3 = jax.random.normal(k4, (B3, C3, H3, W3), jnp.float32)
    tgt3 = jax.random.randint(k5, (B3, H3, W3), 0, C3, jnp.int32)
    loss3 = jax.block_until_ready(
        dice_loss(inp3, tgt3, C3, softmax=True, ignore=None, tile_rows=8))
    ref3 = _reference_dice_loss(inp3, tgt3, C3, softmax=True, ignore=None)
    np.testing.assert_allclose(np.asarray(loss3), np.asarray(ref3),
                               rtol=1e-4, atol=1e-5)

    # Case 4: non-128-divisible spatial size (10x12) — padded path with softmax
    # and no ignore (padded pixels masked via label == -1 in-kernel).
    B4, C4, H4, W4 = 2, 5, 10, 12
    inp4 = jax.random.normal(k6, (B4, C4, H4, W4), jnp.float32)
    tgt4 = jax.random.randint(k2, (B4, H4, W4), 0, C4, jnp.int32)
    loss4 = jax.block_until_ready(
        dice_loss(inp4, tgt4, C4, softmax=True, ignore=None))
    ref4 = _reference_dice_loss(inp4, tgt4, C4, softmax=True, ignore=None)
    np.testing.assert_allclose(np.asarray(loss4), np.asarray(ref4),
                               rtol=1e-4, atol=1e-5)

    print("KERNEL_OK")
</pallas_src>

<mosaic_0001>
module attributes {stable_mosaic.version = 11 : i64} {
  func.func @_dice_sums_kernel(%arg0: i32, %arg1: i32, %arg2: i32, %arg3: memref<1x4x8x128xf32, #tpu.memory_space<vmem>>, %arg4: memref<1x8x128xi32, #tpu.memory_space<vmem>>, %arg5: memref<1x8x128xf32, #tpu.memory_space<vmem>>, %arg6: memref<1x1x3x4xf32, #tpu.memory_space<vmem>>, %arg7: memref<3x4x128xf32, #tpu.memory_space<vmem>>) attributes {dimension_semantics = [#tpu.dimension_semantics<parallel>, #tpu.dimension_semantics<parallel>, #tpu.dimension_semantics<arbitrary>], iteration_bounds = array<i64: 2, 1, 1>, scalar_prefetch = 0 : i64, scratch_operands = 1 : i64, tpu.core_type = #tpu.core_type<tc>, window_params = [{transform_indices = @transform_0, window_bounds = array<i64: 1, 4, 8, 128>}, {transform_indices = @transform_1, window_bounds = array<i64: 1, 8, 128>}, {transform_indices = @transform_2, window_bounds = array<i64: 1, 8, 128>}, {transform_indices = @transform_3, window_bounds = array<i64: 1, 1, 3, 4>}]} {
    %c0_i32 = arith.constant 0 : i32
    %0 = arith.cmpi eq, %arg2, %c0_i32 : i32
    %1 = arith.extui %0 : i1 to i32
    %c0_i32_0 = arith.constant 0 : i32
    %2 = arith.cmpi ne, %1, %c0_i32_0 : i32
    scf.if %2 {
      %cst_114 = arith.constant 0.000000e+00 : f32
      %169 = vector.broadcast %cst_114 : f32 to vector<3x4x128xf32>
      %c0_115 = arith.constant 0 : index
      %c0_116 = arith.constant 0 : index
      %c0_117 = arith.constant 0 : index
      %170 = vector.load %arg7[%c0_115, %c0_116, %c0_117] : memref<3x4x128xf32, #tpu.memory_space<vmem>>, vector<3x4x128xf32>
      tpu.vector_store %arg7[%c0_115, %c0_116, %c0_117], %169 {strides = array<i32>} : memref<3x4x128xf32, #tpu.memory_space<vmem>>, vector<3x4x128xf32>,
    } else {
    }
    %c0 = arith.constant 0 : index
    %c0_1 = arith.constant 0 : index
    %c0_2 = arith.constant 0 : index
    %3 = vector.load %arg4[%c0, %c0_1, %c0_2] : memref<1x8x128xi32, #tpu.memory_space<vmem>>, vector<1x8x128xi32>
    %4 = vector.shape_cast %3 : vector<1x8x128xi32> to vector<8x128xi32>
    %c0_3 = arith.constant 0 : index
    %c0_4 = arith.constant 0 : index
    %c0_5 = arith.constant 0 : index
    %5 = vector.load %arg5[%c0_3, %c0_4, %c0_5] : memref<1x8x128xf32, #tpu.memory_space<vmem>>, vector<1x8x128xf32>
    %6 = vector.shape_cast %5 : vector<1x8x128xf32> to vector<8x128xf32>
    %cst = arith.constant 1.000000e+00 : f32
    %7 = vector.broadcast %cst : f32 to vector<8x128xf32>
    %8 = arith.cmpf one, %6, %7 : vector<8x128xf32>
    %9 = arith.extui %8 : vector<8x128xi1> to vector<8x128xi32>
    %10 = arith.sitofp %9 : vector<8x128xi32> to vector<8x128xf32>
    %c0_6 = arith.constant 0 : index
    %c0_7 = arith.constant 0 : index
    %c0_8 = arith.constant 0 : index
    %c0_9 = arith.constant 0 : index
    %11 = vector.load %arg3[%c0_6, %c0_7, %c0_8, %c0_9] : memref<1x4x8x128xf32, #tpu.memory_space<vmem>>, vector<1x1x8x128xf32>
    %12 = vector.shape_cast %11 : vector<1x1x8x128xf32> to vector<8x128xf32>
    %c0_10 = arith.constant 0 : index
    %c1 = arith.constant 1 : index
    %c0_11 = arith.constant 0 : index
    %c0_12 = arith.constant 0 : index
    %13 = vector.load %arg3[%c0_10, %c1, %c0_11, %c0_12] : memref<1x4x8x128xf32, #tpu.memory_space<vmem>>, vector<1x1x8x128xf32>
    %14 = vector.shape_cast %13 : vector<1x1x8x128xf32> to vector<8x128xf32>
    %c0_13 = arith.constant 0 : index
    %c2 = arith.constant 2 : index
    %c0_14 = arith.constant 0 : index
    %c0_15 = arith.constant 0 : index
    %15 = vector.load %arg3[%c0_13, %c2, %c0_14, %c0_15] : memref<1x4x8x128xf32, #tpu.memory_space<vmem>>, vector<1x1x8x128xf32>
    %16 = vector.shape_cast %15 : vector<1x1x8x128xf32> to vector<8x128xf32>
    %c0_16 = arith.constant 0 : index
    %c3 = arith.constant 3 : index
    %c0_17 = arith.constant 0 : index
    %c0_18 = arith.constant 0 : index
    %17 = vector.load %arg3[%c0_16, %c3, %c0_17, %c0_18] : memref<1x4x8x128xf32, #tpu.memory_space<vmem>>, vector<1x1x8x128xf32>
    %18 = vector.shape_cast %17 : vector<1x1x8x128xf32> to vector<8x128xf32>
    %19 = arith.maximumf %12, %14 : vector<8x128xf32>
    %20 = arith.maximumf %19, %16 : vector<8x128xf32>
    %21 = arith.maximumf %20, %18 : vector<8x128xf32>
    %22 = arith.subf %12, %21 : vector<8x128xf32>
    %23 = math.exp %22 : vector<8x128xf32>
    %24 = arith.subf %14, %21 : vector<8x128xf32>
    %25 = math.exp %24 : vector<8x128xf32>
    %26 = arith.subf %16, %21 : vector<8x128xf32>
    %27 = math.exp %26 : vector<8x128xf32>
    %28 = arith.subf %18, %21 : vector<8x128xf32>
    %29 = math.exp %28 : vector<8x128xf32>
    %30 = arith.addf %23, %25 : vector<8x128xf32>
    %31 = arith.addf %30, %27 : vector<8x128xf32>
    %32 = arith.addf %31, %29 : vector<8x128xf32>
    %33 = tpu.reciprocal %32 : vector<8x128xf32> -> vector<8x128xf32>
    %34 = arith.mulf %23, %33 : vector<8x128xf32>
    %35 = arith.mulf %25, %33 : vector<8x128xf32>
    %36 = arith.mulf %27, %33 : vector<8x128xf32>
    %37 = arith.mulf %29, %33 : vector<8x128xf32>
    %c0_i32_19 = arith.constant 0 : i32
    %38 = vector.broadcast %c0_i32_19 : i32 to vector<8x128xi32>
    %39 = arith.cmpi eq, %4, %38 : vector<8x128xi32>
    %40 = arith.mulf %34, %10 : vector<8x128xf32>
    %cst_20 = arith.constant 0.000000e+00 : f32
    %41 = vector.broadcast %cst_20 : f32 to vector<8x128xf32>
    %42 = arith.select %39, %10, %41 : vector<8x128xi1>, vector<8x128xf32>
    %c0_21 = arith.constant 0 : index
    %c0_22 = arith.constant 0 : index
    %c0_23 = arith.constant 0 : index
    %43 = vector.load %arg7[%c0_21, %c0_22, %c0_23] : memref<3x4x128xf32, #tpu.memory_space<vmem>>, vector<1x1x128xf32>
    %44 = vector.shape_cast %43 : vector<1x1x128xf32> to vector<1x128xf32>
    %cst_24 = arith.constant 0.000000e+00 : f32
    %45 = vector.broadcast %cst_24 : f32 to vector<8x128xf32>
    %46 = arith.select %39, %40, %45 : vector<8x128xi1>, vector<8x128xf32>
    %cst_25 = arith.constant dense<0.000000e+00> : vector<128xf32>
    %47 = vector.multi_reduction <add>, %46, %cst_25 [0] : vector<8x128xf32> to vector<128xf32>
    %48 = vector.shape_cast %47 : vector<128xf32> to vector<1x128xf32>
    %49 = arith.addf %44, %48 : vector<1x128xf32>
    %c0_26 = arith.constant 0 : index
    %c0_27 = arith.constant 0 : index
    %c0_28 = arith.constant 0 : index
    %50 = vector.load %arg7[%c0_26, %c0_27, %c0_28] : memref<3x4x128xf32, #tpu.memory_space<vmem>>, vector<1x1x128xf32>
    %51 = vector.shape_cast %50 : vector<1x1x128xf32> to vector<1x128xf32>
    %52 = vector.shape_cast %49 : vector<1x128xf32> to vector<1x1x128xf32>
    tpu.vector_store %arg7[%c0_26, %c0_27, %c0_28], %52 {strides = array<i32>} : memref<3x4x128xf32, #tpu.memory_space<vmem>>, vector<1x1x128xf32>,
    %c1_29 = arith.constant 1 : index
    %c0_30 = arith.constant 0 : index
    %c0_31 = arith.constant 0 : index
    %53 = vector.load %arg7[%c1_29, %c0_30, %c0_31] : memref<3x4x128xf32, #tpu.memory_space<vmem>>, vector<1x1x128xf32>
    %54 = vector.shape_cast %53 : vector<1x1x128xf32> to vector<1x128xf32>
    %cst_32 = arith.constant dense<0.000000e+00> : vector<128xf32>
    %55 = vector.multi_reduction <add>, %42, %cst_32 [0] : vector<8x128xf32> to vector<128xf32>
    %56 = vector.shape_cast %55 : vector<128xf32> to vector<1x128xf32>
    %57 = arith.addf %54, %56 : vector<1x128xf32>
    %c1_33 = arith.constant 1 : index
    %c0_34 = arith.constant 0 : index
    %c0_35 = arith.constant 0 : index
    %58 = vector.load %arg7[%c1_33, %c0_34, %c0_35] : memref<3x4x128xf32, #tpu.memory_space<vmem>>, vector<1x1x128xf32>
    %59 = vector.shape_cast %58 : vector<1x1x128xf32> to vector<1x128xf32>
    %60 = vector.shape_cast %57 : vector<1x128xf32> to vector<1x1x128xf32>
    tpu.vector_store %arg7[%c1_33, %c0_34, %c0_35], %60 {strides = array<i32>} : memref<3x4x128xf32, #tpu.memory_space<vmem>>, vector<1x1x128xf32>,
    %c2_36 = arith.constant 2 : index
    %c0_37 = arith.constant 0 : index
    %c0_38 = arith.constant 0 : index
    %61 = vector.load %arg7[%c2_36, %c0_37, %c0_38] : memref<3x4x128xf32, #tpu.memory_space<vmem>>, vector<1x1x128xf32>
    %62 = vector.shape_cast %61 : vector<1x1x128xf32> to vector<1x128xf32>
    %63 = arith.mulf %40, %34 : vector<8x128xf32>
    %cst_39 = arith.constant dense<0.000000e+00> : vector<128xf32>
    %64 = vector.multi_reduction <add>, %63, %cst_39 [0] : vector<8x128xf32> to vector<128xf32>
    %65 = vector.shape_cast %64 : vector<128xf32> to vector<1x128xf32>
    %66 = arith.addf %62, %65 : vector<1x128xf32>
    %c2_40 = arith.constant 2 : index
    %c0_41 = arith.constant 0 : index
    %c0_42 = arith.constant 0 : index
    %67 = vector.load %arg7[%c2_40, %c0_41, %c0_42] : memref<3x4x128xf32, #tpu.memory_space<vmem>>, vector<1x1x128xf32>
    %68 = vector.shape_cast %67 : vector<1x1x128xf32> to vector<1x128xf32>
    %69 = vector.shape_cast %66 : vector<1x128xf32> to vector<1x1x128xf32>
    tpu.vector_store %arg7[%c2_40, %c0_41, %c0_42], %69 {strides = array<i32>} : memref<3x4x128xf32, #tpu.memory_space<vmem>>, vector<1x1x128xf32>,
    %c1_i32 = arith.constant 1 : i32
    %70 = vector.broadcast %c1_i32 : i32 to vector<8x128xi32>
    %71 = arith.cmpi eq, %4, %70 : vector<8x128xi32>
    %72 = arith.mulf %35, %10 : vector<8x128xf32>
    %cst_43 = arith.constant 0.000000e+00 : f32
    %73 = vector.broadcast %cst_43 : f32 to vector<8x128xf32>
    %74 = arith.select %71, %10, %73 : vector<8x128xi1>, vector<8x128xf32>
    %c0_44 = arith.constant 0 : index
    %c1_45 = arith.constant 1 : index
    %c0_46 = arith.constant 0 : index
    %75 = vector.load %arg7[%c0_44, %c1_45, %c0_46] : memref<3x4x128xf32, #tpu.memory_space<vmem>>, vector<1x1x128xf32>
    %76 = vector.shape_cast %75 : vector<1x1x128xf32> to vector<1x128xf32>
    %cst_47 = arith.constant 0.000000e+00 : f32
    %77 = vector.broadcast %cst_47 : f32 to vector<8x128xf32>
    %78 = arith.select %71, %72, %77 : vector<8x128xi1>, vector<8x128xf32>
    %cst_48 = arith.constant dense<0.000000e+00> : vector<128xf32>
    %79 = vector.multi_reduction <add>, %78, %cst_48 [0] : vector<8x128xf32> to vector<128xf32>
    %80 = vector.shape_cast %79 : vector<128xf32> to vector<1x128xf32>
    %81 = arith.addf %76, %80 : vector<1x128xf32>
    %c0_49 = arith.constant 0 : index
    %c1_50 = arith.constant 1 : index
    %c0_51 = arith.constant 0 : index
    %82 = vector.load %arg7[%c0_49, %c1_50, %c0_51] : memref<3x4x128xf32, #tpu.memory_space<vmem>>, vector<1x1x128xf32>
    %83 = vector.shape_cast %82 : vector<1x1x128xf32> to vector<1x128xf32>
    %84 = vector.shape_cast %81 : vector<1x128xf32> to vector<1x1x128xf32>
    tpu.vector_store %arg7[%c0_49, %c1_50, %c0_51], %84 {strides = array<i32>} : memref<3x4x128xf32, #tpu.memory_space<vmem>>, vector<1x1x128xf32>,
    %c1_52 = arith.constant 1 : index
    %c1_53 = arith.constant 1 : index
    %c0_54 = arith.constant 0 : index
    %85 = vector.load %arg7[%c1_52, %c1_53, %c0_54] : memref<3x4x128xf32, #tpu.memory_space<vmem>>, vector<1x1x128xf32>
    %86 = vector.shape_cast %85 : vector<1x1x128xf32> to vector<1x128xf32>
    %cst_55 = arith.constant dense<0.000000e+00> : vector<128xf32>
    %87 = vector.multi_reduction <add>, %74, %cst_55 [0] : vector<8x128xf32> to vector<128xf32>
    %88 = vector.shape_cast %87 : vector<128xf32> to vector<1x128xf32>
    %89 = arith.addf %86, %88 : vector<1x128xf32>
    %c1_56 = arith.constant 1 : index
    %c1_57 = arith.constant 1 : index
    %c0_58 = arith.constant 0 : index
    %90 = vector.load %arg7[%c1_56, %c1_57, %c0_58] : memref<3x4x128xf32, #tpu.memory_space<vmem>>, vector<1x1x128xf32>
    %91 = vector.shape_cast %90 : vector<1x1x128xf32> to vector<1x128xf32>
    %92 = vector.shape_cast %89 : vector<1x128xf32> to vector<1x1x128xf32>
    tpu.vector_store %arg7[%c1_56, %c1_57, %c0_58], %92 {strides = array<i32>} : memref<3x4x128xf32, #tpu.memory_space<vmem>>, vector<1x1x128xf32>,
    %c2_59 = arith.constant 2 : index
    %c1_60 = arith.constant 1 : index
    %c0_61 = arith.constant 0 : index
    %93 = vector.load %arg7[%c2_59, %c1_60, %c0_61] : memref<3x4x128xf32, #tpu.memory_space<vmem>>, vector<1x1x128xf32>
    %94 = vector.shape_cast %93 : vector<1x1x128xf32> to vector<1x128xf32>
    %95 = arith.mulf %72, %35 : vector<8x128xf32>
    %cst_62 = arith.constant dense<0.000000e+00> : vector<128xf32>
    %96 = vector.multi_reduction <add>, %95, %cst_62 [0] : vector<8x128xf32> to vector<128xf32>
    %97 = vector.shape_cast %96 : vector<128xf32> to vector<1x128xf32>
    %98 = arith.addf %94, %97 : vector<1x128xf32>
    %c2_63 = arith.constant 2 : index
    %c1_64 = arith.constant 1 : index
    %c0_65 = arith.constant 0 : index
    %99 = vector.load %arg7[%c2_63, %c1_64, %c0_65] : memref<3x4x128xf32, #tpu.memory_space<vmem>>, vector<1x1x128xf32>
    %100 = vector.shape_cast %99 : vector<1x1x128xf32> to vector<1x128xf32>
    %101 = vector.shape_cast %98 : vector<1x128xf32> to vector<1x1x128xf32>
    tpu.vector_store %arg7[%c2_63, %c1_64, %c0_65], %101 {strides = array<i32>} : memref<3x4x128xf32, #tpu.memory_space<vmem>>, vector<1x1x128xf32>,
    %c2_i32 = arith.constant 2 : i32
    %102 = vector.broadcast %c2_i32 : i32 to vector<8x128xi32>
    %103 = arith.cmpi eq, %4, %102 : vector<8x128xi32>
    %104 = arith.mulf %36, %10 : vector<8x128xf32>
    %cst_66 = arith.constant 0.000000e+00 : f32
    %105 = vector.broadcast %cst_66 : f32 to vector<8x128xf32>
    %106 = arith.select %103, %10, %105 : vector<8x128xi1>, vector<8x128xf32>
    %c0_67 = arith.constant 0 : index
    %c2_68 = arith.constant 2 : index
    %c0_69 = arith.constant 0 : index
    %107 = vector.load %arg7[%c0_67, %c2_68, %c0_69] : memref<3x4x128xf32, #tpu.memory_space<vmem>>, vector<1x1x128xf32>
    %108 = vector.shape_cast %107 : vector<1x1x128xf32> to vector<1x128xf32>
    %cst_70 = arith.constant 0.000000e+00 : f32
    %109 = vector.broadcast %cst_70 : f32 to vector<8x128xf32>
    %110 = arith.select %103, %104, %109 : vector<8x128xi1>, vector<8x128xf32>
    %cst_71 = arith.constant dense<0.000000e+00> : vector<128xf32>
    %111 = vector.multi_reduction <add>, %110, %cst_71 [0] : vector<8x128xf32> to vector<128xf32>
    %112 = vector.shape_cast %111 : vector<128xf32> to vector<1x128xf32>
    %113 = arith.addf %108, %112 : vector<1x128xf32>
    %c0_72 = arith.constant 0 : index
    %c2_73 = arith.constant 2 : index
    %c0_74 = arith.constant 0 : index
    %114 = vector.load %arg7[%c0_72, %c2_73, %c0_74] : memref<3x4x128xf32, #tpu.memory_space<vmem>>, vector<1x1x128xf32>
    %115 = vector.shape_cast %114 : vector<1x1x128xf32> to vector<1x128xf32>
    %116 = vector.shape_cast %113 : vector<1x128xf32> to vector<1x1x128xf32>
    tpu.vector_store %arg7[%c0_72, %c2_73, %c0_74], %116 {strides = array<i32>} : memref<3x4x128xf32, #tpu.memory_space<vmem>>, vector<1x1x128xf32>,
    %c1_75 = arith.constant 1 : index
    %c2_76 = arith.constant 2 : index
    %c0_77 = arith.constant 0 : index
    %117 = vector.load %arg7[%c1_75, %c2_76, %c0_77] : memref<3x4x128xf32, #tpu.memory_space<vmem>>, vector<1x1x128xf32>
    %118 = vector.shape_cast %117 : vector<1x1x128xf32> to vector<1x128xf32>
    %cst_78 = arith.constant dense<0.000000e+00> : vector<128xf32>
    %119 = vector.multi_reduction <add>, %106, %cst_78 [0] : vector<8x128xf32> to vector<128xf32>
    %120 = vector.shape_cast %119 : vector<128xf32> to vector<1x128xf32>
    %121 = arith.addf %118, %120 : vector<1x128xf32>
    %c1_79 = arith.constant 1 : index
    %c2_80 = arith.constant 2 : index
    %c0_81 = arith.constant 0 : index
    %122 = vector.load %arg7[%c1_79, %c2_80, %c0_81] : memref<3x4x128xf32, #tpu.memory_space<vmem>>, vector<1x1x128xf32>
    %123 = vector.shape_cast %122 : vector<1x1x128xf32> to vector<1x128xf32>
    %124 = vector.shape_cast %121 : vector<1x128xf32> to vector<1x1x128xf32>
    tpu.vector_store %arg7[%c1_79, %c2_80, %c0_81], %124 {strides = array<i32>} : memref<3x4x128xf32, #tpu.memory_space<vmem>>, vector<1x1x128xf32>,
    %c2_82 = arith.constant 2 : index
    %c2_83 = arith.constant 2 : index
    %c0_84 = arith.constant 0 : index
    %125 = vector.load %arg7[%c2_82, %c2_83, %c0_84] : memref<3x4x128xf32, #tpu.memory_space<vmem>>, vector<1x1x128xf32>
    %126 = vector.shape_cast %125 : vector<1x1x128xf32> to vector<1x128xf32>
    %127 = arith.mulf %104, %36 : vector<8x128xf32>
    %cst_85 = arith.constant dense<0.000000e+00> : vector<128xf32>
    %128 = vector.multi_reduction <add>, %127, %cst_85 [0] : vector<8x128xf32> to vector<128xf32>
    %129 = vector.shape_cast %128 : vector<128xf32> to vector<1x128xf32>
    %130 = arith.addf %126, %129 : vector<1x128xf32>
    %c2_86 = arith.constant 2 : index
    %c2_87 = arith.constant 2 : index
    %c0_88 = arith.constant 0 : index
    %131 = vector.load %arg7[%c2_86, %c2_87, %c0_88] : memref<3x4x128xf32, #tpu.memory_space<vmem>>, vector<1x1x128xf32>
    %132 = vector.shape_cast %131 : vector<1x1x128xf32> to vector<1x128xf32>
    %133 = vector.shape_cast %130 : vector<1x128xf32> to vector<1x1x128xf32>
    tpu.vector_store %arg7[%c2_86, %c2_87, %c0_88], %133 {strides = array<i32>} : memref<3x4x128xf32, #tpu.memory_space<vmem>>, vector<1x1x128xf32>,
    %c3_i32 = arith.constant 3 : i32
    %134 = vector.broadcast %c3_i32 : i32 to vector<8x128xi32>
    %135 = arith.cmpi eq, %4, %134 : vector<8x128xi32>
    %136 = arith.mulf %37, %10 : vector<8x128xf32>
    %cst_89 = arith.constant 0.000000e+00 : f32
    %137 = vector.broadcast %cst_89 : f32 to vector<8x128xf32>
    %138 = arith.select %135, %10, %137 : vector<8x128xi1>, vector<8x128xf32>
    %c0_90 = arith.constant 0 : index
    %c3_91 = arith.constant 3 : index
    %c0_92 = arith.constant 0 : index
    %139 = vector.load %arg7[%c0_90, %c3_91, %c0_92] : memref<3x4x128xf32, #tpu.memory_space<vmem>>, vector<1x1x128xf32>
    %140 = vector.shape_cast %139 : vector<1x1x128xf32> to vector<1x128xf32>
    %cst_93 = arith.constant 0.000000e+00 : f32
    %141 = vector.broadcast %cst_93 : f32 to vector<8x128xf32>
    %142 = arith.select %135, %136, %141 : vector<8x128xi1>, vector<8x128xf32>
    %cst_94 = arith.constant dense<0.000000e+00> : vector<128xf32>
    %143 = vector.multi_reduction <add>, %142, %cst_94 [0] : vector<8x128xf32> to vector<128xf32>
    %144 = vector.shape_cast %143 : vector<128xf32> to vector<1x128xf32>
    %145 = arith.addf %140, %144 : vector<1x128xf32>
    %c0_95 = arith.constant 0 : index
    %c3_96 = arith.constant 3 : index
    %c0_97 = arith.constant 0 : index
    %146 = vector.load %arg7[%c0_95, %c3_96, %c0_97] : memref<3x4x128xf32, #tpu.memory_space<vmem>>, vector<1x1x128xf32>
    %147 = vector.shape_cast %146 : vector<1x1x128xf32> to vector<1x128xf32>
    %148 = vector.shape_cast %145 : vector<1x128xf32> to vector<1x1x128xf32>
    tpu.vector_store %arg7[%c0_95, %c3_96, %c0_97], %148 {strides = array<i32>} : memref<3x4x128xf32, #tpu.memory_space<vmem>>, vector<1x1x128xf32>,
    %c1_98 = arith.constant 1 : index
    %c3_99 = arith.constant 3 : index
    %c0_100 = arith.constant 0 : index
    %149 = vector.load %arg7[%c1_98, %c3_99, %c0_100] : memref<3x4x128xf32, #tpu.memory_space<vmem>>, vector<1x1x128xf32>
    %150 = vector.shape_cast %149 : vector<1x1x128xf32> to vector<1x128xf32>
    %cst_101 = arith.constant dense<0.000000e+00> : vector<128xf32>
    %151 = vector.multi_reduction <add>, %138, %cst_101 [0] : vector<8x128xf32> to vector<128xf32>
    %152 = vector.shape_cast %151 : vector<128xf32> to vector<1x128xf32>
    %153 = arith.addf %150, %152 : vector<1x128xf32>
    %c1_102 = arith.constant 1 : index
    %c3_103 = arith.constant 3 : index
    %c0_104 = arith.constant 0 : index
    %154 = vector.load %arg7[%c1_102, %c3_103, %c0_104] : memref<3x4x128xf32, #tpu.memory_space<vmem>>, vector<1x1x128xf32>
    %155 = vector.shape_cast %154 : vector<1x1x128xf32> to vector<1x128xf32>
    %156 = vector.shape_cast %153 : vector<1x128xf32> to vector<1x1x128xf32>
    tpu.vector_store %arg7[%c1_102, %c3_103, %c0_104], %156 {strides = array<i32>} : memref<3x4x128xf32, #tpu.memory_space<vmem>>, vector<1x1x128xf32>,
    %c2_105 = arith.constant 2 : index
    %c3_106 = arith.constant 3 : index
    %c0_107 = arith.constant 0 : index
    %157 = vector.load %arg7[%c2_105, %c3_106, %c0_107] : memref<3x4x128xf32, #tpu.memory_space<vmem>>, vector<1x1x128xf32>
    %158 = vector.shape_cast %157 : vector<1x1x128xf32> to vector<1x128xf32>
    %159 = arith.mulf %136, %37 : vector<8x128xf32>
    %cst_108 = arith.constant dense<0.000000e+00> : vector<128xf32>
    %160 = vector.multi_reduction <add>, %159, %cst_108 [0] : vector<8x128xf32> to vector<128xf32>
    %161 = vector.shape_cast %160 : vector<128xf32> to vector<1x128xf32>
    %162 = arith.addf %158, %161 : vector<1x128xf32>
    %c2_109 = arith.constant 2 : index
    %c3_110 = arith.constant 3 : index
    %c0_111 = arith.constant 0 : index
    %163 = vector.load %arg7[%c2_109, %c3_110, %c0_111] : memref<3x4x128xf32, #tpu.memory_space<vmem>>, vector<1x1x128xf32>
    %164 = vector.shape_cast %163 : vector<1x1x128xf32> to vector<1x128xf32>
    %165 = vector.shape_cast %162 : vector<1x128xf32> to vector<1x1x128xf32>
    tpu.vector_store %arg7[%c2_109, %c3_110, %c0_111], %165 {strides = array<i32>} : memref<3x4x128xf32, #tpu.memory_space<vmem>>, vector<1x1x128xf32>,
    %c0_i32_112 = arith.constant 0 : i32
    %166 = arith.cmpi eq, %arg2, %c0_i32_112 : i32
    %167 = arith.extui %166 : i1 to i32
    %c0_i32_113 = arith.constant 0 : i32
    %168 = arith.cmpi ne, %167, %c0_i32_113 : i32
    scf.if %168 {
      %c0_114 = arith.constant 0 : index
      %c0_115 = arith.constant 0 : index
      %c0_116 = arith.constant 0 : index
      %169 = vector.load %arg7[%c0_114, %c0_115, %c0_116] : memref<3x4x128xf32, #tpu.memory_space<vmem>>, vector<3x4x128xf32>
      %cst_117 = arith.constant dense<0.000000e+00> : vector<3x4xf32>
      %170 = vector.multi_reduction <add>, %169, %cst_117 [2] : vector<3x4x128xf32> to vector<3x4xf32>
      %c0_118 = arith.constant 0 : index
      %c0_119 = arith.constant 0 : index
      %c0_120 = arith.constant 0 : index
      %c0_121 = arith.constant 0 : index
      %171 = vector.load %arg6[%c0_118, %c0_119, %c0_120, %c0_121] : memref<1x1x3x4xf32, #tpu.memory_space<vmem>>, vector<1x1x3x4xf32>
      %172 = vector.shape_cast %171 : vector<1x1x3x4xf32> to vector<3x4xf32>
      %173 = vector.shape_cast %170 : vector<3x4xf32> to vector<1x1x3x4xf32>
      tpu.vector_store %arg6[%c0_118, %c0_119, %c0_120, %c0_121], %173 {strides = array<i32>} : memref<1x1x3x4xf32, #tpu.memory_space<vmem>>, vector<1x1x3x4xf32>,
    } else {
    }
    return
  }
  func.func @transform_0(%arg0: i32, %arg1: i32, %arg2: i32) -> (i32, i32, i32, i32) {
    %c1_i32 = arith.constant 1 : i32
    %0 = arith.muli %arg1, %c1_i32 : i32
    %1 = arith.addi %0, %arg2 : i32
    %c0_i32 = arith.constant 0 : i32
    %c0_i32_0 = arith.constant 0 : i32
    %c0_i32_1 = arith.constant 0 : i32
    return %arg0, %c0_i32, %1, %c0_i32_0 : i32, i32, i32, i32
  }
  func.func @transform_1(%arg0: i32, %arg1: i32, %arg2: i32) -> (i32, i32, i32) {
    %c1_i32 = arith.constant 1 : i32
    %0 = arith.muli %arg1, %c1_i32 : i32
    %1 = arith.addi %0, %arg2 : i32
    %c0_i32 = arith.constant 0 : i32
    %c0_i32_0 = arith.constant 0 : i32
    return %arg0, %1, %c0_i32 : i32, i32, i32
  }
  func.func @transform_2(%arg0: i32, %arg1: i32, %arg2: i32) -> (i32, i32, i32) {
    %c1_i32 = arith.constant 1 : i32
    %0 = arith.muli %arg1, %c1_i32 : i32
    %1 = arith.addi %0, %arg2 : i32
    %c0_i32 = arith.constant 0 : i32
    %c0_i32_0 = arith.constant 0 : i32
    return %arg0, %1, %c0_i32 : i32, i32, i32
  }
  func.func @transform_3(%arg0: i32, %arg1: i32, %arg2: i32) -> (i32, i32, i32, i32) {
    %c0_i32 = arith.constant 0 : i32
    %c0_i32_0 = arith.constant 0 : i32
    %c0_i32_1 = arith.constant 0 : i32
    return %arg0, %arg1, %c0_i32, %c0_i32_0 : i32, i32, i32, i32
  }
}

</mosaic_0001>

<bundles_post_ra>
// kernel: tpu_custom_call.1
= control target key start
LH: loop header
LB: loop body
LE: loop exit
PB: predicated region body
PF: predicated region fallthrough
CT: control target
= control target key end

     0   :  { %s1096_s0 = inlined_call_operand.hbm [shape: f32[2,4,8,128], index: 0, kind: input, shape index: {}]   ;;  %s1097_s1 = inlined_call_operand.hbm [shape: s32[2,8,128], index: 1, kind: input, shape index: {}]   ;;  %s1098_s2 = inlined_call_operand.hbm [shape: f32[2,8,128], index: 2, kind: input, shape index: {}]   ;;  %s1099_s3 = inlined_call_operand.vmem [shape: f32[2,1,3,4], index: 3, kind: output, shape index: {}]  }
   0x1   :  { %1101 = sst [smem:[#allocation10_spill]] %s1097_s1 }
   0x2   :  { %8 = vsyncpa [#allocation4], 0 }
   0x3   :  { %10 = vsyncpa [#allocation4 + $0x1], 0 }
   0x4   :  { %11 = vsyncpa [#allocation6], 0 }
   0x5   :  { %13 = vsyncpa [#allocation6 + $0x1], 0  ;;  %s923_s12 = smov 0   ;;  %s925_s13 = smov 0  }
   0x6   :  { %s927_s14 = smov 0   ;;  %s929_s15 = smov 0  }
   0x7   :  { %s931_s16 = smov 0   ;;  %s933_s17 = smov 0  }
   0x8 LB: > { %s1100_s18 = sadd.s32 4294967295, %s895_s17   ;;  %s38_s19 = sadd.s32 1, %s891_s16  ;;  %s895_s17 = sphi %s933_s17, %s19_s17   ;;  %s891_s16 = sphi %s931_s16, %s1111_s16   ;;  %s887_s15 = sphi %s929_s15, %s1110_s15   ;;  %s883_s14 = sphi %s927_s14, %s1109_s14   ;;  %s879_s13 = sphi %s925_s13, %s1108_s13   ;;  %s875_s12 = sphi %s923_s12, %s1107_s12  }
   0x9   : > { %p40_p0 = scmp.ge.s32.totalorder %s38_s19, 2  ;;  %s49_s20 = sadd.s32 1, %s883_s14 }
   0xa   : > { %p56_p1 = scmp.ne.s32.totalorder %s883_s14, %s879_s13  ;;  %p57_p2 = scmp.eq.s32.totalorder %s895_s17, 0 }
   0xb   : > { %s1113_s19 = smov (%p40_p0, %s38_s19), 0  ;;  %p62_p4 = scmp.ne.s32.totalorder %s879_s13, %s875_s12 }
   0xc   : > { %p58_p3 = por %p57_p2, %p56_p1  ;;  %s44_s21 = ssub.s32 %s891_s16, %s1113_s19 }
   0xd   : > { %p63_p5 = scmp.eq.s32.totalorder %s1100_s18, 0  ;;  %p47_p6 = scmp.eq.s32.totalorder %s44_s21, 0 }
   0xe   : > { %p695_p8 = scmp.lt.s32.totalorder %s895_s17, 2  ;;  %s973_s24 = sand.u32 1, %s883_s14  }
   0xf   : > { %p964_p7 = por %p63_p5, %p62_p4  ;;  %s197_s26 = sand.u32 1, %s895_s17  }
  0x10   : > { %s970_s23 = scalar_select %p47_p6, %s883_s14, %s49_s20  }
  0x11   : > { %p975_p9 = pnand %p695_p8, %p58_p3  ;;  %s663_s27 = sshll.u32 %s973_s24, 3 }
  0x12   : > { %s664_s28 = sshll.u32 %s891_s16, 7  ;;  %s1104_s1 = sld [smem:[#allocation10_spill]] }
  0x13   : > { %s201_s5 = scalar_lea.vmem [#allocation5], %s663_s27  ;;  %s987_s7 = scalar_lea.sflag [#allocation6], %s197_s26 }
  0x14   : > { %s210_s6 = sshll.u32 %s201_s5, 4  ;;  %p759_p10 = pneg %p975_p9  ;;  %s211_s6 = int_to_ptr.vmem [resolvable:$true] %s210_s6 }
  0x15   : > { %s770_s8 = scalar_lea.vmem %s211_s6, 128  ;;  %s897_s9 = smov [#allocation5]  }
  0x16   : > { %p771_p11 = scmp.ne.s32.totalorder %s211_s6, %s770_s8  ;;  %s775_s10 = sshll.u32 %s897_s9, 4  ;;  %s776_s10 = int_to_ptr.vmem [resolvable:$false] %s775_s10 }
  0x17   : > { %s777_s11 = scalar_lea.vmem %s776_s10, 256  ;;  %p778_p0 = scmp.lt.s32.totalorder %s211_s6, %s776_s10 }
  0x18   : > { %s208_s4 = scalar_lea.hbm %s1104_s1, %s664_s28  ;;  %p773_p12 = pnand %p771_p11, %p759_p10 }
  0x19   : > { %p779_p1 = scmp.lt.s32.totalorder %s777_s11, %s770_s8 }
  0x1a   : > { %p774_p13 = pneg %p773_p12 }
  0x1b   : > { %p780_p2 = por %p779_p1, %p778_p0 }
  0x1d   : > { %p781_p3 = pnand %p780_p2, %p774_p13 }
  0x1f   : > { %784 = shalt.err (!%p781_p3)
}
  0x20   : > { %691 = dma.hbm_to_vmem [thread:$0]  (!%p975_p9), %s208_s4, 128, %s211_s6, %s987_s7  }
  0x21   : > { %s1000_s21 = scalar_lea.hbm %s1098_s2, %s664_s28  ;;  %p667_p4 = scmp.ge.s32.totalorder %s895_s17, 1 }
  0x22   : > { %p235_p5 = scmp.lt.s32.totalorder %s895_s17, 3  ;;  %s660_s29 = sshll.u32 %s973_s24, 5 }
  0x23   : > { %s678_s30 = sshll.u32 %s891_s16, 9  ;;  %s178_s10 = scalar_lea.vmem [#allocation3], %s660_s29 }
  0x24   : > { %p1004_p6 = pnand %p667_p4, %p235_p5  ;;  %s186_s9 = scalar_lea.hbm %s1096_s0, %s678_s30 }
  0x25   : > { %s187_s4 = sshll.u32 %s178_s10, 4  ;;  %s221_s6 = scalar_lea.vmem [#allocation7], %s663_s27  ;;  %s188_s4 = int_to_ptr.vmem [resolvable:$true] %s187_s4 }
  0x26   : > { %s230_s11 = sshll.u32 %s221_s6, 4  ;;  %s175_s28 = scalar_lea.sflag [#allocation4], %s973_s24  ;;  %s231_s11 = int_to_ptr.vmem [resolvable:$true] %s230_s11 }
  0x27   : > { %s798_s12 = scalar_lea.vmem %s188_s4, 512  ;;  %s898_s20 = smov [#allocation3]  }
  0x28   : > { %p799_p8 = scmp.ne.s32.totalorder %s188_s4, %s798_s12  ;;  %s803_s18 = sshll.u32 %s898_s20, 4  ;;  %s804_s18 = int_to_ptr.vmem [resolvable:$false] %s803_s18 }
  0x29   : > { %s805_s1 = scalar_lea.vmem %s804_s18, 1024  ;;  %p806_p13 = scmp.lt.s32.totalorder %s188_s4, %s804_s18 }
  0x2a   : > { %p801_p11 = pnand %p799_p8, %p759_p10  ;;  %p807_p0 = scmp.lt.s32.totalorder %s805_s1, %s798_s12 }
  0x2c   : > { %p802_p12 = pneg %p801_p11  ;;  %p808_p1 = por %p807_p0, %p806_p13 }
  0x2e   : > { %p809_p2 = pnand %p808_p1, %p802_p12 }
  0x30   : > { %812 = shalt.err (!%p809_p2)
}
  0x31   : > { %s899_s29 = smov 128   ;;  %s900_s27 = smov 8  }
  0x32   : > { %688 = dma.hbm_to_vmem [thread:$0]  (!%p975_p9), %s186_s9, 512, %s188_s4, %s175_s28, %s899_s29, %s899_s29, %s900_s27  }
  0x33   : > { %s826_s24 = scalar_lea.vmem %s231_s11, 128  ;;  %s901_s30 = smov [#allocation7]  }
  0x34   : > { %p827_p3 = scmp.ne.s32.totalorder %s231_s11, %s826_s24  ;;  %s831_s5 = sshll.u32 %s901_s30, 4  ;;  %s832_s5 = int_to_ptr.vmem [resolvable:$false] %s831_s5 }
  0x35   : > { %s833_s1 = scalar_lea.vmem %s832_s5, 256  ;;  %p834_p8 = scmp.lt.s32.totalorder %s231_s11, %s832_s5 }
  0x36   : > { %p829_p4 = pnand %p827_p3, %p759_p10  ;;  %p835_p11 = scmp.lt.s32.totalorder %s833_s1, %s826_s24 }
  0x38   : > { %p830_p5 = pneg %p829_p4  ;;  %p836_p12 = por %p835_p11, %p834_p8 }
  0x3a   : > { %p837_p13 = pnand %p836_p12, %p830_p5 }
  0x3c   : > { %840 = shalt.err (!%p837_p13)
}
  0x3d   : > { %694 = dma.hbm_to_vmem [thread:$0]  (!%p975_p9), %s1000_s21, 128, %s231_s11, %s987_s7  }
  0x3e   : > { %239 = sbr.rel (%p1004_p6) target bundleno = 296 (0x128), region = 32  ;;  %s241_s18 = sand.u32 (!%p1004_p6), 1, %s879_s13  }
  0x3f   : > { %s668_s8 = sshll.u32 (!%p1004_p6), %s241_s18, 5  ;;  %s242_s9 = scalar_lea.sflag (!%p1004_p6), [#allocation4], %s241_s18 }
  0x40   : > { %s245_s10 = scalar_lea.vmem (!%p1004_p6), [#allocation3], %s668_s8 }
  0x43   : > { %866 = dma.done.wait (%p964_p7), %s242_s9, 512  }
  0x44   : > { %868 = vsyncadd (%p964_p7), %s242_s9, 4294966784  ;;  %s1106_s4 = sadd.s32 4294967295, %s895_s17   ;;  %s669_s6 = sshll.u32 %s241_s18, 3 }
  0x45   : > { %s250_s25 = sand.u32 1, %s1106_s4   ;;  %s254_s21 = scalar_lea.vmem [#allocation5], %s669_s6 }
  0x46   : > { %s251_s7 = scalar_lea.sflag [#allocation6], %s250_s25 }
  0x47   : > { %870 = dma.done.wait (%p964_p7), %s251_s7, 256  }
  0x48   : > { %872 = vsyncadd (%p964_p7), %s251_s7, 4294967040  ;;  %v902_v0 = vmov 0.0   ;;  %v1041_v1 = vld [vmem:[%s254_s21] sm:$0xff]  ;;  %s263_s26 = scalar_lea.vmem [#allocation7], %s669_s6  ;;  %v674_v5 = vld [vmem:[%s245_s10 + $0x10] sm:$0xff]  ;;  %vm486_vm5 = vcmask 1043456  }
  0x49   : > { %312 = vst [vmem:[#allocation2] sm:$0xf] %v902_v0  ;;  %313 = vst [vmem:[#allocation2 + $0x4] sm:$0xf] %v902_v0  ;;  %v316_v2 = vld [vmem:[%s263_s26] sm:$0xff]  ;;  %v320_v3 = vld [vmem:[%s245_s10] sm:$0xff] }
  0x4a   : > { %314 = vst [vmem:[#allocation2 + $0x8] sm:$0xf] %v902_v0  ;;  %vm317_vm0 = vcmp.ne.f32.partialorder %v316_v2, 1.0  ;;  %v673_v4 = vld [vmem:[%s245_s10 + $0x8] sm:$0xff]  ;;  %vm350_vm1 = vcmp.eq.s32.totalorder %v1041_v1, 0  ;;  %v675_v8 = vld [vmem:[%s245_s10 + $0x18] sm:$0xff] }
  0x4b   : > { %v1043_v6 = vsel %vm317_vm0, 1.0, %v902_v0  ;;  %v327_v7 = vmax.f32 %v320_v3, %v673_v4  ;;  %vm384_vm2 = vcmp.eq.s32.totalorder %v1041_v1, 1  ;;  %vm416_vm3 = vcmp.eq.s32.totalorder %v1041_v1, 2  ;;  %p301_p7 = scmp.lt.s32.totalorder %s887_s15, 1 }
  0x4c   : > { %v352_v9 = vsel %vm350_vm1, %v1043_v6, 0.0  ;;  %vm448_vm4 = vcmp.eq.s32.totalorder %v1041_v1, 3  ;;  %v386_v12 = vsel %vm384_vm2, %v1043_v6, 0.0  ;;  %v418_v14 = vsel %vm416_vm3, %v1043_v6, 0.0 }
  0x4d   : > { %v328_v10 = vmax.f32 %v327_v7, %v674_v5  ;;  %v365_v11 = vrot.slane %v352_v9, 4  ;;  %v398_v13 = vrot.slane %v386_v12, 4  ;;  %v450_v15 = vsel %vm448_vm4, %v1043_v6, 0.0  ;;  %s1115_s15 = smov (!%p301_p7, %s887_s15), 1 }
  0x4e   : > { %v430_v18 = vrot.slane %v418_v14, 4  ;;  %v462_v19 = vrot.slane %v450_v15, 4  ;;  %s671_s22 = sshll.u32 %s1115_s15, 2  ;;  %vm513_vm6 = vcmask 1041409   ;;  %vm515_vm7 = vcmask 1042434  }
  0x4f   : > { %v329_v16 = vmax.f32 %v328_v10, %v675_v8  ;;  %v366_v17 = vadd.f32 %v365_v11, %v352_v9  ;;  %v399_v20 = vadd.f32 %v398_v13, %v386_v12  ;;  %s307_s12 = scalar_lea.vmem %s1099_s3, %s671_s22  ;;  %vm518_vm8 = vcmask 26624  }
  0x50   : > { %v431_v27 = vadd.f32 %v430_v18, %v418_v14  ;;  %v463_v28 = vadd.f32 %v462_v19, %v450_v15  ;;  %v364_v40 = vld [vmem:[#allocation2 + $0x4] sm:$0x1]  ;;  %v397_v41 = vld [vmem:[#allocation2 + $0x5] sm:$0x1]  ;;  %v429_v46 = vld [vmem:[#allocation2 + $0x6] sm:$0x1] }
  0x51   : > { %v330_v21 = vsub.f32 %v320_v3, %v329_v16  ;;  %v333_v22 = vsub.f32 %v673_v4, %v329_v16  ;;  %v336_v23 = vsub.f32 %v674_v5, %v329_v16  ;;  %v339_v24 = vsub.f32 %v675_v8, %v329_v16  ;;  %v461_v51 = vld [vmem:[#allocation2 + $0x7] sm:$0x1] }
  0x52   : > { %v367_v25 = vrot.slane %v366_v17, 2  ;;  %v400_v26 = vrot.slane %v399_v20, 2  ;;  %v432_v35 = vrot.slane %v431_v27, 2  ;;  %v464_v36 = vrot.slane %v463_v28, 2 }
  0x53   : > { %v331_v29 = vmul.f32 1.442695, %v330_v21  ;;  %v334_v30 = vmul.f32 1.442695, %v333_v22  ;;  %v337_v31 = vmul.f32 1.442695, %v336_v23 }
  0x54   : > { %v340_v32 = vmul.f32 1.442695, %v339_v24  ;;  %v368_v33 = vadd.f32 %v367_v25, %v366_v17  ;;  %v401_v34 = vadd.f32 %v400_v26, %v399_v20  ;;  %v433_v39 = vadd.f32 %v432_v35, %v431_v27 }
  0x55   : > { %747 = vpow2.f32 %v331_v29  ;;  %v465_v42 = vadd.f32 %v464_v36, %v463_v28 }
  0x56   : > { %749 = vpow2.f32 %v334_v30  ;;  %v369_v37 = vrot.slane %v368_v33, 1  ;;  %v402_v38 = vrot.slane %v401_v34, 1  ;;  %v434_v45 = vrot.slane %v433_v39, 1 }
  0x57   : > { %751 = vpow2.f32 %v337_v31  ;;  %v466_v47 = vrot.slane %v465_v42, 1 }
  0x58   : > { %753 = vpow2.f32 %v340_v32  ;;  %v370_v43 = vadd.f32 %v369_v37, %v368_v33  ;;  %v403_v44 = vadd.f32 %v402_v38, %v401_v34  ;;  %v435_v50 = vadd.f32 %v434_v45, %v433_v39 }
  0x59   : > { %v467_v52 = vadd.f32 %v466_v47, %v465_v42 }
  0x5a   : > { %v371_v48 = vadd.f32 %v370_v43, %v364_v40  ;;  %v404_v49 = vadd.f32 %v403_v44, %v397_v41  ;;  %v436_v53 = vadd.f32 %v435_v50, %v429_v46  ;;  %v353_v43 = vld [vmem:[#allocation2] sm:$0x1]  ;;  %v451_v50 = vld [vmem:[#allocation2 + $0x3] sm:$0x1] }
  0x5b   : > { %v468_v54 = vadd.f32 %v467_v52, %v461_v51 }
  0x5c   : > { %372 = vst [vmem:[#allocation2 + $0x4] sm:$0x1] %v371_v48  ;;  %405 = vst [vmem:[#allocation2 + $0x5] sm:$0x1] %v404_v49  ;;  %v387_v48 = vld [vmem:[#allocation2 + $0x1] sm:$0x1] }
  0x5d   : > { %437 = vst [vmem:[#allocation2 + $0x6] sm:$0x1] %v436_v53  ;;  %469 = vst [vmem:[#allocation2 + $0x7] sm:$0x1] %v468_v54  ;;  %v419_v49 = vld [vmem:[#allocation2 + $0x2] sm:$0x1] }
  0x62   : > { %v748_v55 = vpop.eup %747 }
  0x63   : > { %v750_v56 = vpop.eup %749 }
  0x64   : > { %v752_v57 = vpop.eup %751  ;;  %v342_v58 = vadd.f32 %v750_v56, %v748_v55 }
  0x65   : > { %v754_v59 = vpop.eup %753 }
  0x66   : > { %v343_v60 = vadd.f32 %v752_v57, %v342_v58 }
  0x68   : > { %v344_v61 = vadd.f32 %v754_v59, %v343_v60 }
  0x6a   : > { %755 = vrcp.f32 %v344_v61 }
  0x77   : > { %v756_v62 = vpop.eup %755 }
  0x78   : > { %v346_v63 = vmul.f32 %v756_v62, %v748_v55  ;;  %v347_v0 = vmul.f32 %v756_v62, %v750_v56  ;;  %v348_v2 = vmul.f32 %v756_v62, %v752_v57  ;;  %v349_v3 = vmul.f32 %v756_v62, %v754_v59  ;;  %v374_v59 = vld [vmem:[#allocation2 + $0x8] sm:$0x1] }
  0x7a   : > { %v351_v4 = vmul.f32 %v1043_v6, %v346_v63  ;;  %v385_v5 = vmul.f32 %v1043_v6, %v347_v0  ;;  %v417_v7 = vmul.f32 %v1043_v6, %v348_v2  ;;  %v449_v8 = vmul.f32 %v1043_v6, %v349_v3 }
  0x7c   : > { %v354_v9 = vsel %vm350_vm1, %v351_v4, 0.0  ;;  %v388_v10 = vsel %vm384_vm2, %v385_v5, 0.0  ;;  %v420_v11 = vsel %vm416_vm3, %v417_v7, 0.0  ;;  %v452_v12 = vsel %vm448_vm4, %v449_v8, 0.0 }
  0x7d   : > { %v355_v13 = vrot.slane %v354_v9, 4  ;;  %v389_v14 = vrot.slane %v388_v10, 4  ;;  %v421_v15 = vrot.slane %v420_v11, 4  ;;  %v453_v16 = vrot.slane %v452_v12, 4 }
  0x7e   : > { %v375_v17 = vmul.f32 %v351_v4, %v346_v63  ;;  %v407_v18 = vmul.f32 %v385_v5, %v347_v0  ;;  %v439_v19 = vmul.f32 %v417_v7, %v348_v2  ;;  %v471_v6 = vmul.f32 %v449_v8, %v349_v3  ;;  %v406_v5 = vld [vmem:[#allocation2 + $0x9] sm:$0x1]  ;;  %v438_v7 = vld [vmem:[#allocation2 + $0xa] sm:$0x1]  ;;  %v470_v8 = vld [vmem:[#allocation2 + $0xb] sm:$0x1] }
  0x7f   : > { %v356_v20 = vadd.f32 %v355_v13, %v354_v9  ;;  %v390_v21 = vadd.f32 %v389_v14, %v388_v10  ;;  %v422_v22 = vadd.f32 %v421_v15, %v420_v11  ;;  %v454_v23 = vadd.f32 %v453_v16, %v452_v12 }
  0x80   : > { %v376_v24 = vrot.slane %v375_v17, 4  ;;  %v408_v25 = vrot.slane %v407_v18, 4  ;;  %v440_v26 = vrot.slane %v439_v19, 4  ;;  %v472_v27 = vrot.slane %v471_v6, 4 }
  0x81   : > { %v357_v28 = vrot.slane %v356_v20, 2  ;;  %v391_v29 = vrot.slane %v390_v21, 2  ;;  %v423_v1 = vrot.slane %v422_v22, 2  ;;  %v455_v30 = vrot.slane %v454_v23, 2 }
  0x82   : > { %v377_v31 = vadd.f32 %v376_v24, %v375_v17  ;;  %v409_v32 = vadd.f32 %v408_v25, %v407_v18  ;;  %v441_v33 = vadd.f32 %v440_v26, %v439_v19  ;;  %v473_v34 = vadd.f32 %v472_v27, %v471_v6  ;;  %v484_v18 = vld [vmem:[#allocation2 + $0x4] sm:$0xf] }
  0x83   : > { %v358_v35 = vadd.f32 %v357_v28, %v356_v20  ;;  %v392_v36 = vadd.f32 %v391_v29, %v390_v21  ;;  %v424_v37 = vadd.f32 %v423_v1, %v422_v22  ;;  %v456_v38 = vadd.f32 %v455_v30, %v454_v23 }
  0x84   : > { %v378_v39 = vrot.slane %v377_v31, 2  ;;  %v410_v40 = vrot.slane %v409_v32, 2  ;;  %v442_v41 = vrot.slane %v441_v33, 2  ;;  %v474_v42 = vrot.slane %v473_v34, 2 }
  0x85   : > { %v359_v44 = vrot.slane %v358_v35, 1  ;;  %v393_v45 = vrot.slane %v392_v36, 1  ;;  %v425_v46 = vrot.slane %v424_v37, 1  ;;  %v457_v47 = vrot.slane %v456_v38, 1 }
  0x86   : > { %v379_v51 = vadd.f32 %v378_v39, %v377_v31  ;;  %v411_v52 = vadd.f32 %v410_v40, %v409_v32  ;;  %v443_v53 = vadd.f32 %v442_v41, %v441_v33  ;;  %v475_v54 = vadd.f32 %v474_v42, %v473_v34 }
  0x87   : > { %v360_v55 = vadd.f32 %v359_v44, %v358_v35  ;;  %v394_v56 = vadd.f32 %v393_v45, %v392_v36  ;;  %v426_v57 = vadd.f32 %v425_v46, %v424_v37  ;;  %v458_v58 = vadd.f32 %v457_v47, %v456_v38 }
  0x88   : > { %v380_v60 = vrot.slane %v379_v51, 1  ;;  %v412_v61 = vrot.slane %v411_v52, 1  ;;  %v444_v62 = vrot.slane %v443_v53, 1  ;;  %v476_v63 = vrot.slane %v475_v54, 1 }
  0x89   : > { %v361_v0 = vadd.f32 %v360_v55, %v353_v43  ;;  %v395_v2 = vadd.f32 %v394_v56, %v387_v48  ;;  %v427_v3 = vadd.f32 %v426_v57, %v419_v49  ;;  %v459_v4 = vadd.f32 %v458_v58, %v451_v50 }
  0x8a   : > { %v381_v9 = vadd.f32 %v380_v60, %v379_v51  ;;  %v413_v10 = vadd.f32 %v412_v61, %v411_v52  ;;  %v445_v11 = vadd.f32 %v444_v62, %v443_v53  ;;  %v477_v12 = vadd.f32 %v476_v63, %v475_v54 }
  0x8b   : > { %362 = vst [vmem:[#allocation2] sm:$0x1] %v361_v0  ;;  %396 = vst [vmem:[#allocation2 + $0x1] sm:$0x1] %v395_v2  ;;  %v490_v6 = vsel %vm486_vm5, %v484_v18, 0.0  ;;  %v499_v22 = vlaneseq }
  0x8c   : > { %428 = vst [vmem:[#allocation2 + $0x2] sm:$0x1] %v427_v3  ;;  %460 = vst [vmem:[#allocation2 + $0x3] sm:$0x1] %v459_v4  ;;  %v382_v13 = vadd.f32 %v381_v9, %v374_v59  ;;  %v414_v14 = vadd.f32 %v413_v10, %v406_v5  ;;  %v446_v15 = vadd.f32 %v445_v11, %v438_v7 }
  0x8d   : > { %v478_v16 = vadd.f32 %v477_v12, %v470_v8  ;;  %v500_v23 = vand.u32 127, %v499_v22  ;;  %v502_v24 = vshrl.u32 %v499_v22, 7 }
  0x8e   : > { %383 = vst [vmem:[#allocation2 + $0x8] sm:$0x1] %v382_v13  ;;  %415 = vst [vmem:[#allocation2 + $0x9] sm:$0x1] %v414_v14 }
  0x8f   : > { %447 = vst [vmem:[#allocation2 + $0xa] sm:$0x1] %v446_v15  ;;  %479 = vst [vmem:[#allocation2 + $0xb] sm:$0x1] %v478_v16  ;;  %v503_v26 = vsub.s32 %v500_v23, %v502_v24 }
  0x93   : > { %v483_v17 = vld [vmem:[#allocation2] sm:$0xf] }
  0x94   : > { %v487_v19 = vsel %vm486_vm5, %v483_v17, 0.0 }
  0x95   : > { %488 = vadd.xlane.f32.xlu0 %v487_v19 }
  0x96   : > { %v485_v20 = vld [vmem:[#allocation2 + $0x8] sm:$0xf] }
  0x97   : > { %v493_v21 = vsel %vm486_vm5, %v485_v20, 0.0 }
  0x98   : > { %494 = vadd.xlane.f32.xlu1 %v493_v21 }
  0x99   : > { %491 = vadd.xlane.f32.xlu0 %v490_v6 }
 0x11e   : > { %v489_v25 = vpop.xlane.xlu0 %488 }
 0x11f   : > { %v504_v1 = vrot.slane %v489_v25, %v503_v26 }
 0x121   : > { %v495_v27 = vpop.xlane.xlu1 %494 }
 0x122   : > { %v492_v28 = vpop.xlane.xlu0 %491  ;;  %v512_v29 = vrot.slane %v495_v27, %v503_v26 }
 0x123   : > { %v508_v30 = vrot.slane %v492_v28, %v503_v26 }
 0x125   : > { %v514_v31 = vsel %vm513_vm6, %v508_v30, %v504_v1 }
 0x126   : > { %v516_v32 = vsel %vm515_vm7, %v512_v29, %v514_v31 }
 0x127   : > { %519 = vst.msk [vmem:[%s307_s12] sm:$0x7] %vm518_vm8, %v516_v32 }
 0x128 PF: > { %s19_s17 = sadd.s32 1, %s895_s17   ;;  %s1107_s12 = smov %s879_s13 }
 0x129   : > { %p16_p9 = scmp.ge.s32.totalorder %s19_s17, 4   ;;  %s1108_s13 = smov %s883_s14 }
 0x12a   : > { %s1109_s14 = smov %s970_s23  ;;  %s1110_s15 = smov %s891_s16 }
 0x12b   : > { %s1111_s16 = smov %s1113_s19  ;;  %18 = sbr.rel (!%p16_p9) target bundleno = 8 (0x8), region = 109 }
 0x130   :  { %545 = vsyncpa [#allocation4], 1 }
 0x131   :  { %547 = vsyncpa [#allocation4 + $0x1], 1 }
 0x132   :  { %548 = vsyncpa [#allocation6], 1 }
 0x133   :  { %550 = vsyncpa [#allocation6 + $0x1], 1 }

</bundles_post_ra>
